<compile_context>
chip_gen: v6e
topology: v6e:2x2x1
jax: 0.10.0
libtpu: 0.0.40
codegen_flags: <defaults>
</compile_context>

<pallas_src>
import functools

import jax
import jax.numpy as jnp
from jax.experimental import pallas as pl
from jax.experimental.pallas import tpu as pltpu

_LANE = 128
_SUBLANE = 8


def _round_up(x, m):
    return (x + m - 1) // m * m


def _sublane(dtype):
    # Sub-32-bit dtypes pack along sublanes: f32 -> 8 rows, bf16 -> 16, int8/fp8 -> 32.
    return max(_SUBLANE, 32 // jnp.dtype(dtype).itemsize)


def classifier_head_kernel(x_ref, w1_ref, b1_ref, w2_ref, b2_ref, o_ref):
    # x_ref:  (TB, in_dim)
    # w1_ref: (in_dim, hidden)   b1_ref: (1, hidden)
    # w2_ref: (hidden, n_cls)    b2_ref: (1, n_cls)
    # o_ref:  (TB, n_cls)
    x = x_ref[...]
    h = jnp.dot(x, w1_ref[...], preferred_element_type=jnp.float32)
    h = h + b1_ref[...].astype(jnp.float32)
    h = jnp.maximum(h, 0.0)  # ReLU in f32 (v5e VPU has no bf16 path)
    # Dropout(0.3): eval-mode semantics -> identity (deterministic forward).
    # TODO(synk): training-mode dropout would use pltpu.prng_seed / prng_random_bits.
    y = jnp.dot(h.astype(w2_ref.dtype), w2_ref[...], preferred_element_type=jnp.float32)
    y = y + b2_ref[...].astype(jnp.float32)
    o_ref[...] = y.astype(o_ref.dtype)


@functools.partial(jax.jit, static_argnames=("block_b",))
def classifier_head(x, w1, b1, w2, b2, *, block_b=4096):
    B, in_dim = x.shape
    hidden = w1.shape[1]
    n_cls = w2.shape[1]

    b1_2d = b1.reshape(1, hidden)
    b2_2d = b2.reshape(1, n_cls)

    # Batch tile: big enough to amortize ~0.35 us/step grid overhead, rounded to the
    # dtype's sublane packing, clamped to the batch, and capped so the grid keeps
    # >= ~4 steps when B is large (double-buffer overlap; >=2 tiles per v7x TC).
    sub = _sublane(x.dtype)
    grid_cap = max(_round_up(pl.cdiv(B, 4), sub), sub)
    tb = max(sub, min(_round_up(block_b, sub), _round_up(B, sub), grid_cap))
    grid = (pl.cdiv(B, tb),)

    # Explicit VMEM budget: 2x double-buffered x / out tiles, resident W1/b1/W2/b2,
    # plus the f32 (tb, hidden) and f32 (tb, n_cls->lane-padded) intermediates.
    in_isz = jnp.dtype(x.dtype).itemsize
    w_isz = jnp.dtype(w1.dtype).itemsize
    n_cls_lanes = _round_up(n_cls, _LANE)  # vreg lane padding for in-VMEM tiles
    vmem_bytes = (
        2 * tb * in_dim * in_isz                      # double-buffered x tiles
        + 2 * tb * n_cls_lanes * in_isz               # double-buffered out tiles
        + (in_dim * hidden + hidden) * w_isz          # W1 / b1 (resident)
        + (hidden * n_cls_lanes + n_cls_lanes) * w_isz  # W2 / b2 (resident)
        + tb * hidden * 4                             # f32 hidden intermediate
        + tb * n_cls_lanes * 4                        # f32 y before output cast
    )
    try:
        phys_vmem = int(pltpu.get_tpu_info().vmem_capacity_bytes)
    except Exception:
        phys_vmem = 64 << 20  # conservative cap (v7x per-TC VMEM)
    vmem_limit = min(max(2 * int(vmem_bytes) + (4 << 20), 32 << 20), phys_vmem)

    # Advisory cost estimate: this call is HBM-bound (x + out streams dominate).
    flops = 2 * B * (in_dim * hidden + hidden * n_cls)
    bytes_accessed = (
        B * in_dim * in_isz
        + B * n_cls * in_isz
        + (in_dim * hidden + hidden + hidden * n_cls + n_cls) * w_isz
    )
    cost = pl.CostEstimate(flops=flops, transcendentals=0, bytes_accessed=bytes_accessed)

    out = pl.pallas_call(
        classifier_head_kernel,
        out_shape=jax.ShapeDtypeStruct((B, n_cls), x.dtype),
        grid_spec=pltpu.PrefetchScalarGridSpec(
            num_scalar_prefetch=0,
            grid=grid,
            in_specs=[
                pl.BlockSpec((tb, in_dim), lambda i: (i, 0)),      # x tile over batch
                pl.BlockSpec((in_dim, hidden), lambda i: (0, 0)),  # W1 (resident)
                pl.BlockSpec((1, hidden), lambda i: (0, 0)),       # b1 (resident)
                pl.BlockSpec((hidden, n_cls), lambda i: (0, 0)),   # W2 (resident)
                pl.BlockSpec((1, n_cls), lambda i: (0, 0)),        # b2 (resident)
            ],
            out_specs=pl.BlockSpec((tb, n_cls), lambda i: (i, 0)),  # unpadded HBM output
        ),
        compiler_params=pltpu.CompilerParams(
            dimension_semantics=("parallel",),
            vmem_limit_bytes=int(vmem_limit),
        ),
        cost_estimate=cost,
    )(x, w1, b1_2d, w2, b2_2d)

    return out


def init_params(key, in_dim=128, hidden=64, num_classes=10, dtype=jnp.float32):
    """Deterministic init mirroring nn.Linear default (U[-1/sqrt(fan_in), 1/sqrt(fan_in)])."""
    k1, k2, k3, k4 = jax.random.split(key, 4)
    bound1 = 1.0 / jnp.sqrt(in_dim)
    bound2 = 1.0 / jnp.sqrt(hidden)
    w1 = jax.random.uniform(k1, (in_dim, hidden), dtype, -bound1, bound1)
    b1 = jax.random.uniform(k2, (hidden,), dtype, -bound1, bound1)
    w2 = jax.random.uniform(k3, (hidden, num_classes), dtype, -bound2, bound2)
    b2 = jax.random.uniform(k4, (num_classes,), dtype, -bound2, bound2)
    return w1, b1, w2, b2


if __name__ == "__main__":
    key = jax.random.PRNGKey(0)
    kx, kp = jax.random.split(key)

    in_dim, hidden, num_classes = 128, 64, 10
    w1, b1, w2, b2 = init_params(kp, in_dim, hidden, num_classes)

    def ref_fwd(xx):
        return jnp.maximum(xx.astype(jnp.float32) @ w1 + b1, 0.0) @ w2 + b2

    # Small-shape check (B=8), matching the module's natural usage.
    x_small = jax.random.normal(kx, (8, in_dim), jnp.float32)
    out_small = jax.block_until_ready(classifier_head(x_small, w1, b1, w2, b2))
    assert out_small.shape == (8, num_classes)
    assert jnp.allclose(out_small, ref_fwd(x_small), atol=1e-5, rtol=1e-5)

    # Multi-tile check: grid-cap logic keeps >= 4 parallel batch tiles at B=2048.
    x_big = jax.random.normal(kx, (2048, in_dim), jnp.float32)
    out_big = jax.block_until_ready(classifier_head(x_big, w1, b1, w2, b2))
    assert out_big.shape == (2048, num_classes)
    assert jnp.allclose(out_big, ref_fwd(x_big), atol=1e-4, rtol=1e-4)

    # bf16 streaming path (used when the producing layer already emits bf16;
    # the cast here is test-only, not part of the wrapper).
    out_bf16 = jax.block_until_ready(
        classifier_head(
            x_big.astype(jnp.bfloat16),
            w1.astype(jnp.bfloat16), b1.astype(jnp.bfloat16),
            w2.astype(jnp.bfloat16), b2.astype(jnp.bfloat16),
        )
    )
    assert out_bf16.shape == (2048, num_classes)
    assert jnp.allclose(out_bf16.astype(jnp.float32), ref_fwd(x_big), atol=2e-1, rtol=1e-1)

    print("KERNEL_OK")
</pallas_src>

<mosaic_0001>
module attributes {stable_mosaic.version = 11 : i64} {
  func.func @classifier_head_kernel(%arg0: i32, %arg1: memref<8x128xf32, #tpu.memory_space<vmem>>, %arg2: memref<128x64xf32, #tpu.memory_space<vmem>>, %arg3: memref<1x64xf32, #tpu.memory_space<vmem>>, %arg4: memref<64x10xf32, #tpu.memory_space<vmem>>, %arg5: memref<1x10xf32, #tpu.memory_space<vmem>>, %arg6: memref<8x10xf32, #tpu.memory_space<vmem>>) attributes {dimension_semantics = [#tpu.dimension_semantics<parallel>], iteration_bounds = array<i64: 1>, scalar_prefetch = 0 : i64, scratch_operands = 0 : i64, tpu.core_type = #tpu.core_type<tc>, window_params = [{transform_indices = @transform_0, window_bounds = array<i64: 8, 128>}, {pipeline_mode = #tpu.pipeline_mode<synchronous>, transform_indices = @transform_1, window_bounds = array<i64: 128, 64>}, {pipeline_mode = #tpu.pipeline_mode<synchronous>, transform_indices = @transform_2, window_bounds = array<i64: 1, 64>}, {pipeline_mode = #tpu.pipeline_mode<synchronous>, transform_indices = @transform_3, window_bounds = array<i64: 64, 10>}, {pipeline_mode = #tpu.pipeline_mode<synchronous>, transform_indices = @transform_4, window_bounds = array<i64: 1, 10>}, {transform_indices = @transform_5, window_bounds = array<i64: 8, 10>}]} {
    %c0 = arith.constant 0 : index
    %c0_0 = arith.constant 0 : index
    %0 = vector.load %arg1[%c0, %c0_0] : memref<8x128xf32, #tpu.memory_space<vmem>>, vector<8x128xf32>
    %c0_1 = arith.constant 0 : index
    %c0_2 = arith.constant 0 : index
    %1 = vector.load %arg2[%c0_1, %c0_2] : memref<128x64xf32, #tpu.memory_space<vmem>>, vector<128x64xf32>
    %cst = arith.constant dense<0.000000e+00> : vector<8x64xf32>
    %2 = tpu.matmul %0, %1, %cst {dimension_numbers = #tpu.dot_dimension_numbers<[1], [0], [0], [1], [0, 0, 1, 1], [], []>} : vector<8x128xf32>, vector<128x64xf32>, vector<8x64xf32> -> vector<8x64xf32>
    %c0_3 = arith.constant 0 : index
    %c0_4 = arith.constant 0 : index
    %3 = vector.load %arg3[%c0_3, %c0_4] : memref<1x64xf32, #tpu.memory_space<vmem>>, vector<1x64xf32>
    %4 = vector.broadcast %3 : vector<1x64xf32> to vector<8x64xf32>
    %5 = arith.addf %2, %4 : vector<8x64xf32>
    %cst_5 = arith.constant 0.000000e+00 : f32
    %6 = vector.broadcast %cst_5 : f32 to vector<8x64xf32>
    %7 = arith.maximumf %5, %6 : vector<8x64xf32>
    %c0_6 = arith.constant 0 : index
    %c0_7 = arith.constant 0 : index
    %8 = vector.load %arg4[%c0_6, %c0_7] : memref<64x10xf32, #tpu.memory_space<vmem>>, vector<64x10xf32>
    %cst_8 = arith.constant dense<0.000000e+00> : vector<8x10xf32>
    %9 = tpu.matmul %7, %8, %cst_8 {dimension_numbers = #tpu.dot_dimension_numbers<[1], [0], [0], [1], [0, 0, 1, 1], [], []>} : vector<8x64xf32>, vector<64x10xf32>, vector<8x10xf32> -> vector<8x10xf32>
    %c0_9 = arith.constant 0 : index
    %c0_10 = arith.constant 0 : index
    %10 = vector.load %arg5[%c0_9, %c0_10] : memref<1x10xf32, #tpu.memory_space<vmem>>, vector<1x10xf32>
    %11 = vector.broadcast %10 : vector<1x10xf32> to vector<8x10xf32>
    %12 = arith.addf %9, %11 : vector<8x10xf32>
    %c0_11 = arith.constant 0 : index
    %c0_12 = arith.constant 0 : index
    %13 = vector.load %arg6[%c0_11, %c0_12] : memref<8x10xf32, #tpu.memory_space<vmem>>, vector<8x10xf32>
    tpu.vector_store %arg6[%c0_11, %c0_12], %12 {strides = array<i32>} : memref<8x10xf32, #tpu.memory_space<vmem>>, vector<8x10xf32>,
    return
  }
  func.func @transform_0(%arg0: i32) -> (i32, i32) {
    %c0_i32 = arith.constant 0 : i32
    %c0_i32_0 = arith.constant 0 : i32
    return %arg0, %c0_i32 : i32, i32
  }
  func.func @transform_1(%arg0: i32) -> (i32, i32) {
    %c0_i32 = arith.constant 0 : i32
    %c0_i32_0 = arith.constant 0 : i32
    %c0_i32_1 = arith.constant 0 : i32
    return %c0_i32, %c0_i32_0 : i32, i32
  }
  func.func @transform_2(%arg0: i32) -> (i32, i32) {
    %c0_i32 = arith.constant 0 : i32
    %c0_i32_0 = arith.constant 0 : i32
    %c0_i32_1 = arith.constant 0 : i32
    return %c0_i32, %c0_i32_0 : i32, i32
  }
  func.func @transform_3(%arg0: i32) -> (i32, i32) {
    %c0_i32 = arith.constant 0 : i32
    %c0_i32_0 = arith.constant 0 : i32
    %c0_i32_1 = arith.constant 0 : i32
    return %c0_i32, %c0_i32_0 : i32, i32
  }
  func.func @transform_4(%arg0: i32) -> (i32, i32) {
    %c0_i32 = arith.constant 0 : i32
    %c0_i32_0 = arith.constant 0 : i32
    %c0_i32_1 = arith.constant 0 : i32
    return %c0_i32, %c0_i32_0 : i32, i32
  }
  func.func @transform_5(%arg0: i32) -> (i32, i32) {
    %c0_i32 = arith.constant 0 : i32
    %c0_i32_0 = arith.constant 0 : i32
    return %arg0, %c0_i32 : i32, i32
  }
}

</mosaic_0001>

<bundles_post_ra>
// kernel: classifier_head.1
= control target key start
LH: loop header
LB: loop body
LE: loop exit
PB: predicated region body
PF: predicated region fallthrough
CT: control target
= control target key end

     0   :  { %v329_v1 = vmov 0.0   ;;  %vm330_vm0 = vmmov 0   ;;  %s472_s0 = inlined_call_operand.vmem [shape: f32[8,128], index: 0, kind: input, shape index: {}]   ;;  %s473_s1 = inlined_call_operand.vmem [shape: f32[128,64], index: 1, kind: input, shape index: {}]   ;;  %s474_s2 = inlined_call_operand.vmem [shape: f32[1,64], index: 2, kind: input, shape index: {}]   ;;  %s475_s3 = inlined_call_operand.vmem [shape: f32[64,10], index: 3, kind: input, shape index: {}]   ;;  %s476_s4 = inlined_call_operand.vmem [shape: f32[1,10], index: 4, kind: input, shape index: {}]   ;;  %s477_s5 = inlined_call_operand.hbm [shape: f32[8,10], index: 5, kind: output, shape index: {}]  }
   0x1   :  { %v37_v0 = vld [vmem:[%s473_s1 + $0x78] sm:$0xff]  ;;  %250 = vmatprep.subr.mxu0 %v329_v1  ;;  %v36_v2 = vld [vmem:[%s473_s1 + $0x70] sm:$0xff]  ;;  %282 = vmatprep.mubr.msk.f32.mxu0 %vm330_vm0, %v329_v1  ;;  %v35_v3 = vld [vmem:[%s473_s1 + $0x68] sm:$0xff] }
   0x2   :  { %251 = vmatpush3.msra.mxu0 %v37_v0  ;;  %285 = vmatprep.subr.mxu1 %v329_v1  ;;  %v34_v4 = vld [vmem:[%s473_s1 + $0x60] sm:$0xff]  ;;  %v123_v5 = vld [vmem:[%s475_s3 + $0x38] sm:$0xff]  ;;  %v122_v6 = vld [vmem:[%s475_s3 + $0x30] sm:$0xff] }
   0x3   :  { %252 = vmatprep.subr.mxu0 %v329_v1  ;;  %301 = vmatprep.mubr.msk.f32.mxu1 %vm330_vm0, %v329_v1  ;;  %v33_v7 = vld [vmem:[%s473_s1 + $0x58] sm:$0xff]  ;;  %v121_v8 = vld [vmem:[%s475_s3 + $0x28] sm:$0xff] }
   0x4   :  { %253 = vmatpush3.msra.mxu0 %v36_v2  ;;  %286 = vmatpush3.msra.mxu1 %v123_v5 }
   0x5   :  { %254 = vmatprep.subr.mxu0 %v329_v1  ;;  %287 = vmatprep.subr.mxu1 %v329_v1 }
   0x6   :  { %255 = vmatpush3.msra.mxu0 %v35_v3 }
   0x7   :  { %256 = vmatprep.subr.mxu0 %v329_v1 }
   0x8   :  { %10 = vsyncpa [#allocation3], 0  ;;  %257 = vmatpush3.msra.mxu0 %v34_v4  ;;  %288 = vmatpush3.msra.mxu1 %v122_v6  ;;  %v32_v9 = vld [vmem:[%s473_s1 + $0x50] sm:$0xff]  ;;  %v120_v10 = vld [vmem:[%s475_s3 + $0x20] sm:$0xff]  ;;  %vm131_vm1 = vcmask 523264   ;;  %s331_s20 = smov [#allocation2]  }
   0x9   :  { %258 = vmatprep.subr.mxu0 %v329_v1  ;;  %289 = vmatprep.subr.mxu1 %v329_v1  ;;  %v31_v11 = vld [vmem:[%s473_s1 + $0x48] sm:$0xff]  ;;  %v119_v12 = vld [vmem:[%s475_s3 + $0x18] sm:$0xff]  ;;  %v30_v13 = vld [vmem:[%s473_s1 + $0x40] sm:$0xff]  ;;  %s213_s21 = sshll.u32 %s331_s20, 4  ;;  %vm205_vm2 = vcmask 80896   ;;  %s214_s21 = int_to_ptr.vmem [resolvable:$true] %s213_s21 }
   0xa   :  { %259 = vmatpush3.msra.mxu0 %v33_v7  ;;  %290 = vmatpush3.msra.mxu1 %v121_v8  ;;  %v29_v14 = vld [vmem:[%s473_s1 + $0x38] sm:$0xff]  ;;  %v28_v15 = vld [vmem:[%s473_s1 + $0x30] sm:$0xff]  ;;  %v27_v16 = vld [vmem:[%s473_s1 + $0x28] sm:$0xff]  ;;  %p312_p1 = scmp.lt.s32.totalorder %s214_s21, %s214_s21 }
   0xb   :  { %260 = vmatprep.subr.mxu0 %v329_v1  ;;  %291 = vmatprep.subr.mxu1 %v329_v1  ;;  %v26_v17 = vld [vmem:[%s473_s1 + $0x20] sm:$0xff]  ;;  %v25_v18 = vld [vmem:[%s473_s1 + $0x18] sm:$0xff]  ;;  %v24_v19 = vld [vmem:[%s473_s1 + $0x10] sm:$0xff] }
   0xc   :  { %261 = vmatpush3.msra.mxu0 %v32_v9  ;;  %292 = vmatpush3.msra.mxu1 %v120_v10  ;;  %v23_v20 = vld [vmem:[%s473_s1 + $0x8] sm:$0xff]  ;;  %v22_v21 = vld [vmem:[%s473_s1] sm:$0xff]  ;;  %v118_v23 = vld [vmem:[%s475_s3 + $0x10] sm:$0xff] }
   0xd   :  { %262 = vmatprep.subr.mxu0 %v329_v1  ;;  %293 = vmatprep.subr.mxu1 %v329_v1  ;;  %v21_v22 = vld [vmem:[%s472_s0] sm:$0xff]  ;;  %v117_v24 = vld [vmem:[%s475_s3 + $0x8] sm:$0xff] }
   0xe   :  { %263 = vmatpush3.msra.mxu0 %v31_v11  ;;  %294 = vmatpush3.msra.mxu1 %v119_v12  ;;  %v116_v25 = vld [vmem:[%s475_s3] sm:$0xff]  ;;  %s307_s3 = scalar_lea.vmem %s214_s21, 128 }
   0xf   :  { %264 = vmatprep.subr.mxu0 %v329_v1  ;;  %295 = vmatprep.subr.mxu1 %v329_v1  ;;  %v221_v26 = vld [vmem:[%s474_s2] ss:$0 sm:$0xff]  ;;  %p308_p0 = scmp.ne.s32.totalorder %s214_s21, %s307_s3  ;;  %p313_p2 = scmp.lt.s32.totalorder %s307_s3, %s307_s3 }
  0x10   :  { %265 = vmatpush3.msra.mxu0 %v30_v13  ;;  %296 = vmatpush3.msra.mxu1 %v118_v23  ;;  %v222_v31 = vld [vmem:[%s476_s4] ss:$0 sm:$0xff] }
  0x11   :  { %266 = vmatprep.subr.mxu0 %v329_v1  ;;  %297 = vmatprep.subr.mxu1 %v329_v1  ;;  %p314_p3 = por %p313_p2, %p312_p1 }
  0x12   :  { %267 = vmatpush3.msra.mxu0 %v29_v14  ;;  %298 = vmatpush3.msra.mxu1 %v117_v24 }
  0x13   :  { %268 = vmatprep.subr.mxu0 %v329_v1  ;;  %299 = vmatprep.subr.mxu1 %v329_v1  ;;  %p315_p4 = pnand %p314_p3, %p308_p0 }
  0x14   :  { %269 = vmatpush3.msra.mxu0 %v28_v15  ;;  %300 = vmatpush3.msra.mxu1 %v116_v25 }
  0x15   :  { %270 = vmatprep.subr.mxu0 %v329_v1 }
  0x16   :  { %271 = vmatpush3.msra.mxu0 %v27_v16 }
  0x17   :  { %272 = vmatprep.subr.mxu0 %v329_v1 }
  0x18   :  { %273 = vmatpush3.msra.mxu0 %v26_v17 }
  0x19   :  { %274 = vmatprep.subr.mxu0 %v329_v1 }
  0x1a   :  { %275 = vmatpush3.msra.mxu0 %v25_v18 }
  0x1b   :  { %276 = vmatprep.subr.mxu0 %v329_v1 }
  0x1c   :  { %277 = vmatpush3.msra.mxu0 %v24_v19 }
  0x1d   :  { %278 = vmatprep.subr.mxu0 %v329_v1 }
  0x1e   :  { %279 = vmatpush3.msra.mxu0 %v23_v20 }
  0x1f   :  { %280 = vmatprep.subr.mxu0 %v329_v1 }
  0x20   :  { %281 = vmatpush3.msra.mxu0 %v22_v21 }
  0x21   :  { %283 = vmatmul.mubr.f32.vlgmr.msra.gmra.mxu0 %v21_v22 }
  0xe1   :  { %v111_v27 = vpop.f32.mrf.mxu0 }
  0xe2   :  { %v112_v28 = vadd.f32 %v221_v26, %v111_v27 }
  0xe3   :  { %v284_v29 = vpop.f32.mrf.mxu0 }
  0xe4   :  { %v115_v30 = vmax.f32 %v112_v28, 0.0 }
  0xe6   :  { %302 = vmatmul.mubr.msk.f32.vlgmr.msra.gmra.mxu1 %vm131_vm1, %v115_v30 }
 0x1a6   :  { %v201_v32 = vpop.f32.mrf.mxu1 }
 0x1a7   :  { %v202_v33 = vadd.f32 %v222_v31, %v201_v32 }
 0x1a8   :  { %v303_v34 = vpop.f32.mrf.mxu1 }
 0x1a9   :  { %206 = vst.msk [vmem:[#allocation2] sm:$0xff] %vm205_vm2, %v202_v33 }
 0x1aa   :  { %318 = shalt.err (!%p315_p4)
}
 0x1ab   :  { %216 = dma.vmem_to_hbm [thread:$0]  %s214_s21, 128, %s477_s5, [#allocation3]  }
 0x1ac   :  { %327 = dma.done.wait [#allocation3], 128  }
 0x1ad   :  { %328 = vsyncadd [#allocation3], 4294967168 }
 0x1ae   :  { %220 = vsyncpa [#allocation3], 1 }

</bundles_post_ra>
